<compile_context>
chip_gen: v7x
topology: tpu7x:2x2x1
jax: 0.10.0
libtpu: 0.0.40
codegen_flags: <defaults>
</compile_context>

<pallas_src>
import functools
import math

import jax
import jax.numpy as jnp
from jax.experimental import pallas as pl
from jax.experimental.pallas import tpu as pltpu

HIDDEN = 10  # fixed by the module definition


def _round_up(n: int, m: int) -> int:
    return (n + m - 1) // m * m


def _pack_factor(input_dim: int, output_dim: int) -> int:
    """Smallest row-packing factor P making P*input_dim and P*output_dim multiples of
    128 (lane-dense I/O), capped so the block-diagonal fused weight stays small."""
    p_in = 128 // math.gcd(input_dim, 128)
    p_out = 128 // math.gcd(output_dim, 128)
    lcm = p_in * p_out // math.gcd(p_in, p_out)
    return min(lcm, 64)


def _vmem_capacity_bytes() -> int:
    """Per-generation physical VMEM (64 MiB v7x, 128 MiB v5e/v6e); conservative fallback."""
    try:
        cap = getattr(pltpu.get_tpu_info(), "vmem_capacity_bytes", None)
        if cap:
            return int(cap)
    except Exception:
        pass
    return 64 << 20  # most restrictive generation (v7x per-TC VMEM)


def _fused_encoder_kernel(x_ref, w_ref, b_ref, o_ref):
    """One lane-dense batch tile of the folded chain: y = x @ W_block + b_block."""
    y = jnp.dot(x_ref[...], w_ref[...], preferred_element_type=jnp.float32) + b_ref[...]
    o_ref[...] = y.astype(o_ref.dtype)


@functools.partial(jax.jit, static_argnames=("block_rows",))
def large_linear_encoder(x, params, block_rows=None):
    """params: list of 6 (weight, bias) pairs with weight shaped (out, in) like PyTorch.

    block_rows (optional, static): original batch rows per grid step; default auto-sizes
    tiles to ~4 MiB of streamed traffic per step within the per-generation VMEM budget.
    """
    B, input_dim = x.shape
    output_dim = params[-1][0].shape[0]

    # ---- Fold the activation-free layer chain into one effective affine map (exact f32).
    hp = jax.lax.Precision.HIGHEST
    w_eff = jnp.asarray(params[0][0], jnp.float32).T            # (in, 10)
    b_eff = jnp.asarray(params[0][1], jnp.float32)               # (10,)
    for w, b in params[1:]:
        wt = jnp.asarray(w, jnp.float32).T                       # (prev, next)
        w_eff = jnp.dot(w_eff, wt, precision=hp)
        b_eff = jnp.dot(b_eff, wt, precision=hp) + jnp.asarray(b, jnp.float32)
    # w_eff: (in, out), b_eff: (out,)

    # ---- Lane-dense packing: P original rows per packed row.
    P = _pack_factor(input_dim, output_dim)
    pin, pout = P * input_dim, P * output_dim
    low_prec = x.dtype in (jnp.dtype(jnp.bfloat16), jnp.dtype(jnp.float16))
    w_dtype = x.dtype if low_prec else jnp.float32
    w_block = jnp.kron(jnp.eye(P, dtype=jnp.float32), w_eff).astype(w_dtype)  # (pin, pout) block-diag
    b_block = jnp.tile(b_eff, P).reshape(1, pout)                              # (1, pout), f32

    B_main = (B // P) * P
    G = B_main // P

    def _tail(rows):
        # Tiny (< P rows) remainder handled outside the kernel (avoids padding/re-writing x).
        return (jnp.dot(rows.astype(jnp.float32), w_eff, precision=hp) + b_eff).astype(x.dtype)

    if G == 0:
        # Batch smaller than one packed row: plain-JAX path (kernel not worth launching).
        return _tail(x)

    x_packed = x[:B_main].reshape(G, pin)

    # ---- Tile sizing (lane-dense, so the VMEM byte math below is exact, not 4-8x off).
    itemsize = jnp.dtype(x.dtype).itemsize
    row_bytes = (pin + pout) * itemsize                                   # x + y per packed row
    param_bytes = pin * pout * jnp.dtype(w_dtype).itemsize + 8 * max(pout, 128) * 4
    vmem_cap = _vmem_capacity_bytes()

    if block_rows is not None:
        bg = max(1, int(block_rows) // P)
    else:
        bg = max(8, (4 << 20) // row_bytes)                               # ~4 MiB of x+y per step
        budget = int(0.55 * vmem_cap) - 2 * param_bytes - (4 << 20)       # headroom for scratch
        if budget > 0:
            bg = min(bg, max(8, budget // (2 * row_bytes)))               # double-buffered in+out
        if G >= 16:                                                       # keep >=2 steps (megacore)
            bg = min(bg, _round_up(-(-G // 2), 8))

    bg = min(bg, G)
    if bg < G:
        bg = max(8, (bg // 8) * 8)                                        # sublane-aligned tiles
        if bg >= G:
            bg = G
    num_blocks = pl.cdiv(G, bg)

    need = 2 * bg * row_bytes + 2 * param_bytes + (4 << 20)
    vmem_limit = int(min(max(need, 32 << 20), vmem_cap - (8 << 20)))

    cost = pl.CostEstimate(
        flops=2 * G * pin * pout,
        transcendentals=0,
        bytes_accessed=int(G * row_bytes + pin * pout * jnp.dtype(w_dtype).itemsize + pout * 4),
    )

    out_packed = pl.pallas_call(
        _fused_encoder_kernel,
        out_shape=jax.ShapeDtypeStruct((G, pout), x.dtype),
        grid_spec=pltpu.PrefetchScalarGridSpec(
            num_scalar_prefetch=0,
            grid=(num_blocks,),
            in_specs=[
                pl.BlockSpec((bg, pin), lambda i: (i, 0)),      # streamed lane-dense batch tile
                pl.BlockSpec((pin, pout), lambda i: (0, 0)),    # block-diag W_eff (VMEM resident)
                pl.BlockSpec((1, pout), lambda i: (0, 0)),      # tiled b_eff   (VMEM resident)
            ],
            out_specs=pl.BlockSpec((bg, pout), lambda i: (i, 0)),
        ),
        compiler_params=pltpu.CompilerParams(
            dimension_semantics=("parallel",),    # batch tiles shard across v7x's 2 TCs
            vmem_limit_bytes=vmem_limit,
        ),
        cost_estimate=cost,
    )(x_packed, w_block, b_block)

    out = out_packed.reshape(B_main, output_dim)
    if B_main < B:
        out = jnp.concatenate([out, _tail(x[B_main:])], axis=0)
    return out


def init_params(key, input_dim, output_dim):
    """Deterministic init matching the layer shapes of LargeLinearEncoder.__init__."""
    dims = [(input_dim, HIDDEN), (HIDDEN, HIDDEN), (HIDDEN, HIDDEN),
            (HIDDEN, HIDDEN), (HIDDEN, HIDDEN), (HIDDEN, output_dim)]
    params = []
    for fan_in, fan_out in dims:
        key, kw, kb = jax.random.split(key, 3)
        bound = 1.0 / (fan_in ** 0.5)
        w = jax.random.uniform(kw, (fan_out, fan_in), jnp.float32, -bound, bound)
        b = jax.random.uniform(kb, (fan_out,), jnp.float32, -bound, bound)
        params.append((w, b))
    return params


def reference_forward(x, params):
    """Pure-JAX layer-by-layer reference (exact f32 dots)."""
    h = x
    for w, b in params:
        h = jnp.dot(h, w.T, precision=jax.lax.Precision.HIGHEST) + b
    return h


if __name__ == "__main__":
    key = jax.random.PRNGKey(0)
    kx, kp, kx2 = jax.random.split(key, 3)

    input_dim, output_dim = 32, 16
    params = init_params(kp, input_dim, output_dim)

    # Case 1: batch that packs evenly (B % P == 0, P = 8 here), single-block grid.
    x = jax.random.normal(kx, (64, input_dim), jnp.float32)
    out = jax.block_until_ready(large_linear_encoder(x, params))
    ref = reference_forward(x, params)
    assert out.shape == (64, output_dim)
    assert jnp.allclose(out, ref, atol=1e-4, rtol=1e-3), float(jnp.max(jnp.abs(out - ref)))

    # Case 2: ragged batch with a forced small tile -> multi-step grid with a partial
    # trailing block (masked OOB writes) plus a 2-row non-kernel tail (no jnp.pad of x).
    x2 = jax.random.normal(kx2, (210, input_dim), jnp.float32)
    out2 = jax.block_until_ready(large_linear_encoder(x2, params, block_rows=64))
    ref2 = reference_forward(x2, params)
    assert out2.shape == (210, output_dim)
    assert jnp.allclose(out2, ref2, atol=1e-4, rtol=1e-3), float(jnp.max(jnp.abs(out2 - ref2)))

    print("KERNEL_OK")
</pallas_src>

<mosaic_0001>
module attributes {stable_mosaic.version = 11 : i64} {
  func.func @_fused_encoder_kernel(%arg0: i32, %arg1: memref<8x256xf32, #tpu.memory_space<vmem>>, %arg2: memref<256x128xf32, #tpu.memory_space<vmem>>, %arg3: memref<1x128xf32, #tpu.memory_space<vmem>>, %arg4: memref<8x128xf32, #tpu.memory_space<vmem>>) attributes {dimension_semantics = [#tpu.dimension_semantics<parallel>], iteration_bounds = array<i64: 1>, scalar_prefetch = 0 : i64, scratch_operands = 0 : i64, tpu.core_type = #tpu.core_type<tc>, window_params = [{transform_indices = @transform_0, window_bounds = array<i64: 8, 256>}, {pipeline_mode = #tpu.pipeline_mode<synchronous>, transform_indices = @transform_1, window_bounds = array<i64: 256, 128>}, {pipeline_mode = #tpu.pipeline_mode<synchronous>, transform_indices = @transform_2, window_bounds = array<i64: 1, 128>}, {transform_indices = @transform_3, window_bounds = array<i64: 8, 128>}]} {
    %c0 = arith.constant 0 : index
    %c0_0 = arith.constant 0 : index
    %0 = vector.load %arg1[%c0, %c0_0] : memref<8x256xf32, #tpu.memory_space<vmem>>, vector<8x256xf32>
    %c0_1 = arith.constant 0 : index
    %c0_2 = arith.constant 0 : index
    %1 = vector.load %arg2[%c0_1, %c0_2] : memref<256x128xf32, #tpu.memory_space<vmem>>, vector<256x128xf32>
    %cst = arith.constant dense<0.000000e+00> : vector<8x128xf32>
    %2 = tpu.matmul %0, %1, %cst {dimension_numbers = #tpu.dot_dimension_numbers<[1], [0], [0], [1], [0, 0, 1, 1], [], []>} : vector<8x256xf32>, vector<256x128xf32>, vector<8x128xf32> -> vector<8x128xf32>
    %c0_3 = arith.constant 0 : index
    %c0_4 = arith.constant 0 : index
    %3 = vector.load %arg3[%c0_3, %c0_4] : memref<1x128xf32, #tpu.memory_space<vmem>>, vector<1x128xf32>
    %4 = vector.broadcast %3 : vector<1x128xf32> to vector<8x128xf32>
    %5 = arith.addf %2, %4 : vector<8x128xf32>
    %c0_5 = arith.constant 0 : index
    %c0_6 = arith.constant 0 : index
    %6 = vector.load %arg4[%c0_5, %c0_6] : memref<8x128xf32, #tpu.memory_space<vmem>>, vector<8x128xf32>
    tpu.vector_store %arg4[%c0_5, %c0_6], %5 {strides = array<i32>} : memref<8x128xf32, #tpu.memory_space<vmem>>, vector<8x128xf32>,
    return
  }
  func.func @transform_0(%arg0: i32) -> (i32, i32) {
    %c0_i32 = arith.constant 0 : i32
    %c0_i32_0 = arith.constant 0 : i32
    return %arg0, %c0_i32 : i32, i32
  }
  func.func @transform_1(%arg0: i32) -> (i32, i32) {
    %c0_i32 = arith.constant 0 : i32
    %c0_i32_0 = arith.constant 0 : i32
    %c0_i32_1 = arith.constant 0 : i32
    return %c0_i32, %c0_i32_0 : i32, i32
  }
  func.func @transform_2(%arg0: i32) -> (i32, i32) {
    %c0_i32 = arith.constant 0 : i32
    %c0_i32_0 = arith.constant 0 : i32
    %c0_i32_1 = arith.constant 0 : i32
    return %c0_i32, %c0_i32_0 : i32, i32
  }
  func.func @transform_3(%arg0: i32) -> (i32, i32) {
    %c0_i32 = arith.constant 0 : i32
    %c0_i32_0 = arith.constant 0 : i32
    return %arg0, %c0_i32 : i32, i32
  }
}

</mosaic_0001>

<bundles_post_ra>
// kernel: tile.8
= control target key start
LH: loop header
LB: loop body
LE: loop exit
PB: predicated region body
PF: predicated region fallthrough
CT: control target
= control target key end

     0   :  { %s22_s0 = inlined_call_operand.vmem [shape: f32[16], index: 0, kind: input, shape index: {}]   ;;  %s23_s1 = inlined_call_operand.vmem [shape: f32[8,16], index: 1, kind: output, shape index: {}]  }
   0x1   :  { %v4_v0 = vld [vmem:[%s22_s0] ss:$0 sm:$0xff] }
   0x2   :  { %5 = vst [vmem:[%s23_s1] sm:$0xff] %v4_v0 }

// kernel: tile.9
= control target key start
LH: loop header
LB: loop body
LE: loop exit
PB: predicated region body
PF: predicated region fallthrough
CT: control target
= control target key end

     0   :  { %s67_s10 = smov 112   ;;  %s68_s11 = smov 80   ;;  %vm3_vm0 = vcmask 130048   ;;  %vm9_vm1 = vcmask 1048448   ;;  %vm15_vm2 = vcmask 917248   ;;  %vm21_vm3 = vcmask 786048   ;;  %s111_s0 = inlined_call_operand.vmem [shape: f32[8,16], index: 0, kind: input, shape index: {}]   ;;  %s112_s1 = inlined_call_operand.vmem [shape: f32[1,128], index: 1, kind: output, shape index: {}]  }
   0x1   :  { %v53_v0 = vld [vmem:[%s111_s0 + $0x7] sm:$0x1]   ;;  %v55_v1 = vld [vmem:[%s111_s0 + $0x5] sm:$0x1]   ;;  %v54_v2 = vld [vmem:[%s111_s0 + $0x6] sm:$0x1]  }
   0x2   :  { %7 = vrot.lane.b32.xlu0 %v53_v0, %s67_s10  ;;  %19 = vrot.lane.b32.xlu1 %v55_v1, %s68_s11  ;;  %v56_v3 = vld [vmem:[%s111_s0 + $0x4] sm:$0x1]   ;;  %v2_v4 = vld [vmem:[%s111_s0] sm:$0x1]   ;;  %s69_s18 = smov 96   ;;  %s70_s19 = smov 64  }
   0x3   :  { %4 = vst.msk [vmem:[#allocation0] sm:$0x1] %vm3_vm0, %v2_v4   ;;  %v57_v5 = vld [vmem:[%s111_s0 + $0x3] sm:$0x1]   ;;  %v58_v6 = vld [vmem:[%s111_s0 + $0x2] sm:$0x1]  }
   0x4   :  { %s71_s24 = smov 48   ;;  %s72_s25 = smov 32   ;;  %v59_v7 = vld [vmem:[%s111_s0 + $0x1] sm:$0x1]   ;;  %vm27_vm4 = vcmask 654848   ;;  %vm33_vm5 = vcmask 523648  }
   0x5   :  { %s73_s0 = smov 16   ;;  %vm39_vm6 = vcmask 392448   ;;  %vm45_vm7 = vcmask 261248  }
   0x6   :  { %13 = vrot.lane.b32.xlu0 %v54_v2, %s69_s18  ;;  %25 = vrot.lane.b32.xlu1 %v56_v3, %s70_s19 }
   0xa   :  { %31 = vrot.lane.b32.xlu0 %v57_v5, %s71_s24  ;;  %37 = vrot.lane.b32.xlu1 %v58_v6, %s72_s25 }
   0xe   :  { %43 = vrot.lane.b32.xlu0 %v59_v7, %s73_s0 }
  0x74   :  { %v8_v8 = vpop.permute.xlu0 %7   ;;  %v20_v9 = vpop.permute.xlu1 %19  }
  0x75   :  { %10 = vst.msk [vmem:[#allocation0] sm:$0x1] %vm9_vm1, %v8_v8  }
  0x78   :  { %v14_v10 = vpop.permute.xlu0 %13   ;;  %v26_v11 = vpop.permute.xlu1 %25  }
  0x79   :  { %16 = vst.msk [vmem:[#allocation0] sm:$0x1] %vm15_vm2, %v14_v10  }
  0x7a   :  { %22 = vst.msk [vmem:[#allocation0] sm:$0x1] %vm21_vm3, %v20_v9  }
  0x7b   :  { %28 = vst.msk [vmem:[#allocation0] sm:$0x1] %vm27_vm4, %v26_v11  }
  0x7c   :  { %v32_v12 = vpop.permute.xlu0 %31   ;;  %v38_v13 = vpop.permute.xlu1 %37  }
  0x7d   :  { %34 = vst.msk [vmem:[#allocation0] sm:$0x1] %vm33_vm5, %v32_v12  }
  0x7e   :  { %40 = vst.msk [vmem:[#allocation0] sm:$0x1] %vm39_vm6, %v38_v13  }
  0x80   :  { %v44_v14 = vpop.permute.xlu0 %43  }
  0x81   :  { %46 = vst.msk [vmem:[#allocation0] sm:$0x1] %vm45_vm7, %v44_v14  }
  0x88   :  { %v50_v15 = vld [vmem:[#allocation0] sm:$0x1] }
  0x89   :  { %52 = vst [vmem:[%s112_s1] sm:$0x1] %v50_v15 }

// kernel: large_linear_encoder.1
= control target key start
LH: loop header
LB: loop body
LE: loop exit
PB: predicated region body
PF: predicated region fallthrough
CT: control target
= control target key end

     0   :  { %s326_s1 = inlined_call_operand.vmem [shape: f32[256,128], index: 1, kind: input, shape index: {}]   ;;  %s327_s0 = inlined_call_operand.vmem [shape: f32[8,256], index: 0, kind: input, shape index: {}]   ;;  %s328_s2 = inlined_call_operand.vmem [shape: f32[1,128], index: 2, kind: input, shape index: {}]   ;;  %s329_s3 = inlined_call_operand.vmem [shape: f32[8,128], index: 3, kind: output, shape index: {}]  }
   0x1   :  { %v32_v0 = vld [vmem:[%s326_s1 + $0x80] sm:$0xff]  ;;  %v33_v1 = vld [vmem:[%s326_s1 + $0x88] sm:$0xff]  ;;  %v34_v5 = vld [vmem:[%s326_s1 + $0x90] sm:$0xff] }
   0x2   :  { %v16_v2 = vld [vmem:[%s326_s1] sm:$0xff]  ;;  %v166_v3 = vpack.c.bf16 %v33_v1, %v32_v0  ;;  %v17_v4 = vld [vmem:[%s326_s1 + $0x8] sm:$0xff]  ;;  %v35_v6 = vld [vmem:[%s326_s1 + $0x98] sm:$0xff] }
   0x3   :  { %v168_v7 = vpack.c.bf16 %v17_v4, %v16_v2  ;;  %v170_v8 = vpack.c.bf16 %v35_v6, %v34_v5  ;;  %v18_v9 = vld [vmem:[%s326_s1 + $0x10] sm:$0xff]  ;;  %v19_v10 = vld [vmem:[%s326_s1 + $0x18] sm:$0xff]  ;;  %v36_v11 = vld [vmem:[%s326_s1 + $0xa0] sm:$0xff] }
   0x4   :  { %167 = vmatprep.subr.bf16.mxu0 %v166_v3  ;;  %v37_v12 = vld [vmem:[%s326_s1 + $0xa8] sm:$0xff]  ;;  %v172_v13 = vpack.c.bf16 %v19_v10, %v18_v9  ;;  %v20_v15 = vld [vmem:[%s326_s1 + $0x20] sm:$0xff]  ;;  %v38_v17 = vld [vmem:[%s326_s1 + $0xb0] sm:$0xff] }
   0x5   :  { %169 = vmatpush3.bf16.msra.mxu0 %v168_v7  ;;  %v174_v14 = vpack.c.bf16 %v37_v12, %v36_v11  ;;  %v21_v16 = vld [vmem:[%s326_s1 + $0x28] sm:$0xff]  ;;  %v39_v18 = vld [vmem:[%s326_s1 + $0xb8] sm:$0xff]  ;;  %v22_v21 = vld [vmem:[%s326_s1 + $0x30] sm:$0xff] }
   0x6   :  { %171 = vmatprep.subr.bf16.mxu0 %v170_v8  ;;  %v176_v19 = vpack.c.bf16 %v21_v16, %v20_v15  ;;  %v178_v20 = vpack.c.bf16 %v39_v18, %v38_v17  ;;  %v23_v22 = vld [vmem:[%s326_s1 + $0x38] sm:$0xff]  ;;  %v40_v23 = vld [vmem:[%s326_s1 + $0xc0] sm:$0xff]  ;;  %v41_v24 = vld [vmem:[%s326_s1 + $0xc8] sm:$0xff] }
   0x7   :  { %v15_v25 = vld [vmem:[%s327_s0 + $0x8] sm:$0xff]  ;;  %v180_v26 = vpack.c.bf16 %v23_v22, %v22_v21  ;;  %v182_v27 = vpack.c.bf16 %v41_v24, %v40_v23  ;;  %v24_v28 = vld [vmem:[%s326_s1 + $0x40] sm:$0xff]  ;;  %v42_v30 = vld [vmem:[%s326_s1 + $0xd0] sm:$0xff] }
   0x8   :  { %119 = vmatprep.mubr.f32.mxu0 %v15_v25  ;;  %v25_v29 = vld [vmem:[%s326_s1 + $0x48] sm:$0xff]  ;;  %v43_v31 = vld [vmem:[%s326_s1 + $0xd8] sm:$0xff]  ;;  %v26_v34 = vld [vmem:[%s326_s1 + $0x50] sm:$0xff] }
   0x9   :  { %173 = vmatpush3.bf16.msra.mxu0 %v172_v13  ;;  %v184_v32 = vpack.c.bf16 %v25_v29, %v24_v28  ;;  %v186_v33 = vpack.c.bf16 %v43_v31, %v42_v30  ;;  %v27_v35 = vld [vmem:[%s326_s1 + $0x58] sm:$0xff]  ;;  %v44_v36 = vld [vmem:[%s326_s1 + $0xe0] sm:$0xff]  ;;  %v45_v37 = vld [vmem:[%s326_s1 + $0xe8] sm:$0xff] }
   0xa   :  { %175 = vmatprep.subr.bf16.mxu0 %v174_v14  ;;  %v188_v38 = vpack.c.bf16 %v27_v35, %v26_v34  ;;  %v190_v39 = vpack.c.bf16 %v45_v37, %v44_v36  ;;  %v28_v40 = vld [vmem:[%s326_s1 + $0x60] sm:$0xff]  ;;  %v29_v41 = vld [vmem:[%s326_s1 + $0x68] sm:$0xff]  ;;  %v46_v42 = vld [vmem:[%s326_s1 + $0xf0] sm:$0xff] }
   0xb   :  { %v47_v43 = vld [vmem:[%s326_s1 + $0xf8] sm:$0xff]  ;;  %v192_v44 = vpack.c.bf16 %v29_v41, %v28_v40  ;;  %v30_v46 = vld [vmem:[%s326_s1 + $0x70] sm:$0xff]  ;;  %v14_v49 = vld [vmem:[%s327_s0] sm:$0xff] }
   0xc   :  { %v194_v45 = vpack.c.bf16 %v47_v43, %v46_v42  ;;  %v31_v47 = vld [vmem:[%s326_s1 + $0x78] sm:$0xff]  ;;  %v130_v51 = vld [vmem:[%s328_s2] ss:$0 sm:$0xff] }
   0xd   :  { %177 = vmatpush3.bf16.msra.mxu0 %v176_v19  ;;  %v196_v48 = vpack.c.bf16 %v31_v47, %v30_v46 }
   0xe   :  { %179 = vmatprep.subr.bf16.mxu0 %v178_v20 }
  0x11   :  { %181 = vmatpush3.bf16.msra.mxu0 %v180_v26 }
  0x12   :  { %183 = vmatprep.subr.bf16.mxu0 %v182_v27 }
  0x15   :  { %185 = vmatpush3.bf16.msra.mxu0 %v184_v32 }
  0x16   :  { %187 = vmatprep.subr.bf16.mxu0 %v186_v33 }
  0x19   :  { %189 = vmatpush3.bf16.msra.mxu0 %v188_v38 }
  0x1a   :  { %191 = vmatprep.subr.bf16.mxu0 %v190_v39 }
  0x1d   :  { %193 = vmatpush3.bf16.msra.mxu0 %v192_v44 }
  0x1e   :  { %195 = vmatprep.subr.bf16.mxu0 %v194_v45 }
  0x21   :  { %197 = vmatpush3.bf16.msra.mxu0 %v196_v48 }
  0x24   :  { %120 = vmatmul.mubr.f32.vlgmr.msra.gmra.mrb[0].mxu0 %v14_v49 }
  0xf7   :  { %v163_v50 = vpop.f32.mrb[0].mxu0 }
  0xf8   :  { %v164_v52 = vpop.f32.mrb[1].mxu0 }
  0xf9   :  { %v165_v53 = vadd.f32 %v164_v52, %v163_v50 }
  0xfb   :  { %v122_v54 = vadd.f32 %v165_v53, %v130_v51 }
  0xfd   :  { %125 = vst [vmem:[%s329_s3] sm:$0xff] %v122_v54 }

</bundles_post_ra>
